<compile_context>
chip_gen: v5e
topology: v5e:2x2
jax: 0.10.0
libtpu: 0.0.40
codegen_flags: <defaults>
</compile_context>

<pallas_src>
import functools

import jax
import jax.numpy as jnp
from jax.experimental import pallas as pl
from jax.experimental.pallas import tpu as pltpu

HIDDEN = [50, 50, 50, 50]     # hidden_layers from the PyTorch module
IN_DIM = 1
OUT_DIM = 2

HP = 128                      # padded hidden dim (lane width)
OUT_PAD = 8                   # minimal legal lane width for the output slab
N_MID = len(HIDDEN) - 1       # number of 50x50 hidden-to-hidden layers (3)


def _round_up(x, m):
    return ((x + m - 1) // m) * m


def _cdiv(a, b):
    return (a + b - 1) // b


def _pinn_kernel(t_ref, w1_ref, b1_ref, ws_ref, bs_ref, w5_ref, b5_ref, o_ref,
                 *, matmul_dtype):
    """One batch tile of the whole MLP: 1 VPU layer + 4 MXU matmuls + 4 tanh."""
    # Layer 1 (in_features = 1): broadcast multiply on the VPU instead of a
    # degenerate K=1 MXU matmul.  (TB,1) * (1,128) -> (TB,128).
    h = jnp.tanh(t_ref[...] * w1_ref[...] + b1_ref[...])

    # Three 50x50 hidden layers (padded to 128x128), weights stacked in one
    # VMEM-resident ref.  Static 3-trip loop == fully-unrolled fori_loop.
    # matmul_dtype=f32 makes the astype a no-op; bf16 keeps f32 accumulation.
    for l in range(N_MID):
        acc = jnp.dot(h.astype(matmul_dtype), ws_ref[l].astype(matmul_dtype),
                      preferred_element_type=jnp.float32)
        # TODO(synk): if the bundle dump shows jnp.tanh expanding instead of a
        # native EUP vtanh, rewrite as t=exp(-2x); y=(1-t)*pl.reciprocal(1+t).
        h = jnp.tanh(acc + bs_ref[l])

    # Output layer: w5/b5 are pre-padded to 8 lanes, so this produces the
    # minimal (TB, 8) slab directly (no post-dot lane slice, no wide bias add).
    o_ref[...] = (
        jnp.dot(h.astype(matmul_dtype), w5_ref[...].astype(matmul_dtype),
                preferred_element_type=jnp.float32)
        + b5_ref[...]
    )


@functools.partial(jax.jit, static_argnames=("block_batch", "matmul_dtype"))
def pinn_forward(t, params, *, block_batch=4096, matmul_dtype=jnp.float32):
    """t: [batch, 1] float32 -> [batch, 2] float32 (same as PINN.forward).

    params: tuple of padded arrays from pad_params().
    """
    w1p, b1p, ws, bs, w5p, b5p = params

    batch = t.shape[0]

    # Pick the number of grid steps first, then size the tile from it:
    #   * padding is bounded by < tb rows (never ~2x as with a fixed tile),
    #   * batch > 8 always yields >= 2 steps so v7x's two TensorCores both
    #     get work (dimension_semantics=("parallel",)); the target step count
    #     is evenized before tile sizing for balanced per-core work.
    n_blocks = _cdiv(batch, block_batch)
    if batch > 8:
        n_blocks = max(n_blocks, 2)
    if n_blocks > 1 and n_blocks % 2:
        n_blocks += 1
    tb = _round_up(_cdiv(batch, n_blocks), 8)   # tile rows (multiple of 8)
    n_blocks = _cdiv(batch, tb)
    bpad = n_blocks * tb                         # padded batch (< batch + tb)

    t_p = t.astype(jnp.float32)
    if bpad != batch:
        t_p = jnp.zeros((bpad, IN_DIM), jnp.float32).at[:batch, :].set(t_p)

    kernel = functools.partial(_pinn_kernel, matmul_dtype=matmul_dtype)

    out_p = pl.pallas_call(
        kernel,
        out_shape=jax.ShapeDtypeStruct((bpad, OUT_PAD), jnp.float32),
        grid_spec=pltpu.PrefetchScalarGridSpec(
            num_scalar_prefetch=0,
            grid=(n_blocks,),
            in_specs=[
                pl.BlockSpec((tb, IN_DIM), lambda i: (i, 0)),        # t tile
                pl.BlockSpec((1, HP), lambda i: (0, 0)),             # w1 (resident)
                pl.BlockSpec((1, HP), lambda i: (0, 0)),             # b1 (resident)
                pl.BlockSpec((N_MID, HP, HP), lambda i: (0, 0, 0)),  # stacked hidden W
                pl.BlockSpec((N_MID, 1, HP), lambda i: (0, 0, 0)),   # stacked hidden b
                pl.BlockSpec((HP, OUT_PAD), lambda i: (0, 0)),       # w5 (narrow, resident)
                pl.BlockSpec((1, OUT_PAD), lambda i: (0, 0)),        # b5 (narrow, resident)
            ],
            out_specs=pl.BlockSpec((tb, OUT_PAD), lambda i: (i, 0)),
        ),
        compiler_params=pltpu.CompilerParams(
            dimension_semantics=("parallel",),   # megacore sharding on v7x
            # ~15 MiB needed at tb=4096 (2x input + 2x output buffers, resident
            # weights, ~3 live (tb,128) f32 temporaries); 32 MiB gives headroom
            # on v5e (16 MiB scoped default) and is well under v7x's 64 MiB.
            vmem_limit_bytes=32 * 1024 * 1024,
        ),
    )(t_p, w1p, b1p, ws, bs, w5p, b5p)

    return out_p[:batch, :OUT_DIM]


def init_params(key):
    """Xavier-normal weights (as in the PyTorch __init__), zero biases."""
    dims = [IN_DIM] + HIDDEN + [OUT_DIM]
    params = []
    for i in range(len(dims) - 1):
        fan_in, fan_out = dims[i], dims[i + 1]
        key, sub = jax.random.split(key)
        std = (2.0 / (fan_in + fan_out)) ** 0.5
        w = std * jax.random.normal(sub, (fan_in, fan_out), dtype=jnp.float32)
        b = jnp.zeros((fan_out,), dtype=jnp.float32)
        params.append((w, b))
    return params


def pad_params(params):
    """Zero-pad params into the layout the kernel expects.

    Returns (w1 [1,128], b1 [1,128], ws [3,128,128], bs [3,1,128],
             w5 [128,8], b5 [1,8]).
    """
    (w1, b1) = params[0]
    mids = params[1:-1]
    (w5, b5) = params[-1]

    w1p = jnp.zeros((1, HP), jnp.float32).at[:, : w1.shape[1]].set(w1)
    b1p = jnp.zeros((1, HP), jnp.float32).at[0, : b1.shape[0]].set(b1)

    ws = jnp.zeros((N_MID, HP, HP), jnp.float32)
    bs = jnp.zeros((N_MID, 1, HP), jnp.float32)
    for l, (w, b) in enumerate(mids):
        ws = ws.at[l, : w.shape[0], : w.shape[1]].set(w)
        bs = bs.at[l, 0, : b.shape[0]].set(b)

    # Output layer padded only to 8 lanes: the kernel writes this slab directly.
    w5p = jnp.zeros((HP, OUT_PAD), jnp.float32).at[: w5.shape[0], : w5.shape[1]].set(w5)
    b5p = jnp.zeros((1, OUT_PAD), jnp.float32).at[0, : b5.shape[0]].set(b5)

    return (w1p, b1p, ws, bs, w5p, b5p)


def reference_forward(t, params):
    h = t
    for i, (w, b) in enumerate(params):
        h = h @ w + b
        if i < len(params) - 1:
            h = jnp.tanh(h)
    return h


if __name__ == "__main__":
    key = jax.random.PRNGKey(0)
    key, tkey1, tkey2 = jax.random.split(key, 3)

    params_raw = init_params(key)
    params = pad_params(params_raw)

    # Default config: batch=32 -> 2 grid steps of 16 rows (exercises the
    # multi-step "parallel" grid even at small scale).
    t1 = jax.random.uniform(tkey1, (32, 1), dtype=jnp.float32) * 10.0
    out1 = pinn_forward(t1, params)
    jax.block_until_ready(out1)
    ref1 = reference_forward(t1, params_raw)
    assert out1.shape == (32, 2)
    assert jnp.allclose(out1, ref1, atol=1e-4, rtol=1e-4), (out1, ref1)

    # Batch not a multiple of the tile (40 rows, block_batch=16 -> 3 steps of
    # 16 with 8 padded rows) to exercise the grid and the padded-row path.
    t2 = jax.random.uniform(tkey2, (40, 1), dtype=jnp.float32) * 10.0
    out2 = pinn_forward(t2, params, block_batch=16)
    jax.block_until_ready(out2)
    ref2 = reference_forward(t2, params_raw)
    assert out2.shape == (40, 2)
    assert jnp.allclose(out2, ref2, atol=1e-4, rtol=1e-4), (out2, ref2)

    # Optional bf16-matmul path (f32 accumulation): ~3x fewer MXU cycles, but
    # PINN residuals are precision-sensitive, so this is opt-in and only
    # sanity-checked with a loose tolerance here.
    out3 = pinn_forward(t1, params, matmul_dtype=jnp.bfloat16)
    jax.block_until_ready(out3)
    assert out3.shape == (32, 2)
    assert jnp.allclose(out3, ref1, atol=0.5), (out3, ref1)

    # TODO(synk): compute_derivatives / compute_physics_loss use torch.autograd;
    # differentiating this Pallas forward (d/dt, d2/dt2) needs a custom_vjp or
    # separate backward kernels before it can be used in PINN training.
    print("KERNEL_OK")
</pallas_src>

<mosaic_0001>
module attributes {stable_mosaic.version = 11 : i64} {
  func.func @_pinn_kernel(%arg0: i32, %arg1: memref<16x1xf32, #tpu.memory_space<vmem>>, %arg2: memref<1x128xf32, #tpu.memory_space<vmem>>, %arg3: memref<1x128xf32, #tpu.memory_space<vmem>>, %arg4: memref<3x128x128xf32, #tpu.memory_space<vmem>>, %arg5: memref<3x1x128xf32, #tpu.memory_space<vmem>>, %arg6: memref<128x8xf32, #tpu.memory_space<vmem>>, %arg7: memref<1x8xf32, #tpu.memory_space<vmem>>, %arg8: memref<16x8xf32, #tpu.memory_space<vmem>>) attributes {dimension_semantics = [#tpu.dimension_semantics<parallel>], iteration_bounds = array<i64: 2>, scalar_prefetch = 0 : i64, scratch_operands = 0 : i64, tpu.core_type = #tpu.core_type<tc>, window_params = [{transform_indices = @transform_0, window_bounds = array<i64: 16, 1>}, {pipeline_mode = #tpu.pipeline_mode<synchronous>, transform_indices = @transform_1, window_bounds = array<i64: 1, 128>}, {pipeline_mode = #tpu.pipeline_mode<synchronous>, transform_indices = @transform_2, window_bounds = array<i64: 1, 128>}, {pipeline_mode = #tpu.pipeline_mode<synchronous>, transform_indices = @transform_3, window_bounds = array<i64: 3, 128, 128>}, {pipeline_mode = #tpu.pipeline_mode<synchronous>, transform_indices = @transform_4, window_bounds = array<i64: 3, 1, 128>}, {pipeline_mode = #tpu.pipeline_mode<synchronous>, transform_indices = @transform_5, window_bounds = array<i64: 128, 8>}, {pipeline_mode = #tpu.pipeline_mode<synchronous>, transform_indices = @transform_6, window_bounds = array<i64: 1, 8>}, {transform_indices = @transform_7, window_bounds = array<i64: 16, 8>}]} {
    %c0 = arith.constant 0 : index
    %c0_0 = arith.constant 0 : index
    %0 = vector.load %arg1[%c0, %c0_0] : memref<16x1xf32, #tpu.memory_space<vmem>>, vector<16x1xf32>
    %c0_1 = arith.constant 0 : index
    %c0_2 = arith.constant 0 : index
    %1 = vector.load %arg2[%c0_1, %c0_2] : memref<1x128xf32, #tpu.memory_space<vmem>>, vector<1x128xf32>
    %2 = vector.broadcast %0 : vector<16x1xf32> to vector<16x128xf32>
    %3 = vector.broadcast %1 : vector<1x128xf32> to vector<16x128xf32>
    %4 = arith.mulf %2, %3 : vector<16x128xf32>
    %c0_3 = arith.constant 0 : index
    %c0_4 = arith.constant 0 : index
    %5 = vector.load %arg3[%c0_3, %c0_4] : memref<1x128xf32, #tpu.memory_space<vmem>>, vector<1x128xf32>
    %6 = vector.broadcast %5 : vector<1x128xf32> to vector<16x128xf32>
    %7 = arith.addf %4, %6 : vector<16x128xf32>
    %8 = math.tanh %7 : vector<16x128xf32>
    %c0_5 = arith.constant 0 : index
    %c0_6 = arith.constant 0 : index
    %c0_7 = arith.constant 0 : index
    %9 = vector.load %arg4[%c0_5, %c0_6, %c0_7] : memref<3x128x128xf32, #tpu.memory_space<vmem>>, vector<1x128x128xf32>
    %10 = vector.shape_cast %9 : vector<1x128x128xf32> to vector<128x128xf32>
    %cst = arith.constant dense<0.000000e+00> : vector<16x128xf32>
    %11 = tpu.matmul %8, %10, %cst {dimension_numbers = #tpu.dot_dimension_numbers<[1], [0], [0], [1], [0, 0, 1, 1], [], []>} : vector<16x128xf32>, vector<128x128xf32>, vector<16x128xf32> -> vector<16x128xf32>
    %c0_8 = arith.constant 0 : index
    %c0_9 = arith.constant 0 : index
    %c0_10 = arith.constant 0 : index
    %12 = vector.load %arg5[%c0_8, %c0_9, %c0_10] : memref<3x1x128xf32, #tpu.memory_space<vmem>>, vector<1x1x128xf32>
    %13 = vector.shape_cast %12 : vector<1x1x128xf32> to vector<1x128xf32>
    %14 = vector.broadcast %13 : vector<1x128xf32> to vector<16x128xf32>
    %15 = arith.addf %11, %14 : vector<16x128xf32>
    %16 = math.tanh %15 : vector<16x128xf32>
    %c1 = arith.constant 1 : index
    %c0_11 = arith.constant 0 : index
    %c0_12 = arith.constant 0 : index
    %17 = vector.load %arg4[%c1, %c0_11, %c0_12] : memref<3x128x128xf32, #tpu.memory_space<vmem>>, vector<1x128x128xf32>
    %18 = vector.shape_cast %17 : vector<1x128x128xf32> to vector<128x128xf32>
    %cst_13 = arith.constant dense<0.000000e+00> : vector<16x128xf32>
    %19 = tpu.matmul %16, %18, %cst_13 {dimension_numbers = #tpu.dot_dimension_numbers<[1], [0], [0], [1], [0, 0, 1, 1], [], []>} : vector<16x128xf32>, vector<128x128xf32>, vector<16x128xf32> -> vector<16x128xf32>
    %c1_14 = arith.constant 1 : index
    %c0_15 = arith.constant 0 : index
    %c0_16 = arith.constant 0 : index
    %20 = vector.load %arg5[%c1_14, %c0_15, %c0_16] : memref<3x1x128xf32, #tpu.memory_space<vmem>>, vector<1x1x128xf32>
    %21 = vector.shape_cast %20 : vector<1x1x128xf32> to vector<1x128xf32>
    %22 = vector.broadcast %21 : vector<1x128xf32> to vector<16x128xf32>
    %23 = arith.addf %19, %22 : vector<16x128xf32>
    %24 = math.tanh %23 : vector<16x128xf32>
    %c2 = arith.constant 2 : index
    %c0_17 = arith.constant 0 : index
    %c0_18 = arith.constant 0 : index
    %25 = vector.load %arg4[%c2, %c0_17, %c0_18] : memref<3x128x128xf32, #tpu.memory_space<vmem>>, vector<1x128x128xf32>
    %26 = vector.shape_cast %25 : vector<1x128x128xf32> to vector<128x128xf32>
    %cst_19 = arith.constant dense<0.000000e+00> : vector<16x128xf32>
    %27 = tpu.matmul %24, %26, %cst_19 {dimension_numbers = #tpu.dot_dimension_numbers<[1], [0], [0], [1], [0, 0, 1, 1], [], []>} : vector<16x128xf32>, vector<128x128xf32>, vector<16x128xf32> -> vector<16x128xf32>
    %c2_20 = arith.constant 2 : index
    %c0_21 = arith.constant 0 : index
    %c0_22 = arith.constant 0 : index
    %28 = vector.load %arg5[%c2_20, %c0_21, %c0_22] : memref<3x1x128xf32, #tpu.memory_space<vmem>>, vector<1x1x128xf32>
    %29 = vector.shape_cast %28 : vector<1x1x128xf32> to vector<1x128xf32>
    %30 = vector.broadcast %29 : vector<1x128xf32> to vector<16x128xf32>
    %31 = arith.addf %27, %30 : vector<16x128xf32>
    %32 = math.tanh %31 : vector<16x128xf32>
    %c0_23 = arith.constant 0 : index
    %c0_24 = arith.constant 0 : index
    %33 = vector.load %arg6[%c0_23, %c0_24] : memref<128x8xf32, #tpu.memory_space<vmem>>, vector<128x8xf32>
    %cst_25 = arith.constant dense<0.000000e+00> : vector<16x8xf32>
    %34 = tpu.matmul %32, %33, %cst_25 {dimension_numbers = #tpu.dot_dimension_numbers<[1], [0], [0], [1], [0, 0, 1, 1], [], []>} : vector<16x128xf32>, vector<128x8xf32>, vector<16x8xf32> -> vector<16x8xf32>
    %c0_26 = arith.constant 0 : index
    %c0_27 = arith.constant 0 : index
    %35 = vector.load %arg7[%c0_26, %c0_27] : memref<1x8xf32, #tpu.memory_space<vmem>>, vector<1x8xf32>
    %36 = vector.broadcast %35 : vector<1x8xf32> to vector<16x8xf32>
    %37 = arith.addf %34, %36 : vector<16x8xf32>
    %c0_28 = arith.constant 0 : index
    %c0_29 = arith.constant 0 : index
    %38 = vector.load %arg8[%c0_28, %c0_29] : memref<16x8xf32, #tpu.memory_space<vmem>>, vector<16x8xf32>
    tpu.vector_store %arg8[%c0_28, %c0_29], %37 {strides = array<i32>} : memref<16x8xf32, #tpu.memory_space<vmem>>, vector<16x8xf32>,
    return
  }
  func.func @transform_0(%arg0: i32) -> (i32, i32) {
    %c0_i32 = arith.constant 0 : i32
    %c0_i32_0 = arith.constant 0 : i32
    return %arg0, %c0_i32 : i32, i32
  }
  func.func @transform_1(%arg0: i32) -> (i32, i32) {
    %c0_i32 = arith.constant 0 : i32
    %c0_i32_0 = arith.constant 0 : i32
    %c0_i32_1 = arith.constant 0 : i32
    return %c0_i32, %c0_i32_0 : i32, i32
  }
  func.func @transform_2(%arg0: i32) -> (i32, i32) {
    %c0_i32 = arith.constant 0 : i32
    %c0_i32_0 = arith.constant 0 : i32
    %c0_i32_1 = arith.constant 0 : i32
    return %c0_i32, %c0_i32_0 : i32, i32
  }
  func.func @transform_3(%arg0: i32) -> (i32, i32, i32) {
    %c0_i32 = arith.constant 0 : i32
    %c0_i32_0 = arith.constant 0 : i32
    %c0_i32_1 = arith.constant 0 : i32
    %c0_i32_2 = arith.constant 0 : i32
    return %c0_i32, %c0_i32_0, %c0_i32_1 : i32, i32, i32
  }
  func.func @transform_4(%arg0: i32) -> (i32, i32, i32) {
    %c0_i32 = arith.constant 0 : i32
    %c0_i32_0 = arith.constant 0 : i32
    %c0_i32_1 = arith.constant 0 : i32
    %c0_i32_2 = arith.constant 0 : i32
    return %c0_i32, %c0_i32_0, %c0_i32_1 : i32, i32, i32
  }
  func.func @transform_5(%arg0: i32) -> (i32, i32) {
    %c0_i32 = arith.constant 0 : i32
    %c0_i32_0 = arith.constant 0 : i32
    %c0_i32_1 = arith.constant 0 : i32
    return %c0_i32, %c0_i32_0 : i32, i32
  }
  func.func @transform_6(%arg0: i32) -> (i32, i32) {
    %c0_i32 = arith.constant 0 : i32
    %c0_i32_0 = arith.constant 0 : i32
    %c0_i32_1 = arith.constant 0 : i32
    return %c0_i32, %c0_i32_0 : i32, i32
  }
  func.func @transform_7(%arg0: i32) -> (i32, i32) {
    %c0_i32 = arith.constant 0 : i32
    %c0_i32_0 = arith.constant 0 : i32
    return %arg0, %c0_i32 : i32, i32
  }
}

</mosaic_0001>

<bundles_post_ra>
// kernel: pinn_forward.1
= control target key start
LH: loop header
LB: loop body
LE: loop exit
PB: predicated region body
PF: predicated region fallthrough
CT: control target
= control target key end

     0   :  { %12 = vsyncpa [#allocation3], 0  ;;  %s724_s24 = smov 0   ;;  %s817_s0 = inlined_call_operand.vmem [shape: f32[32,1], index: 0, kind: input, shape index: {}]   ;;  %s818_s1 = inlined_call_operand.vmem [shape: f32[1,128], index: 1, kind: input, shape index: {}]   ;;  %s819_s2 = inlined_call_operand.vmem [shape: f32[1,128], index: 2, kind: input, shape index: {}]   ;;  %s820_s3 = inlined_call_operand.hbm [shape: f32[3,128,128], index: 3, kind: input, shape index: {}]   ;;  %s821_s4 = inlined_call_operand.vmem [shape: f32[3,1,128], index: 4, kind: input, shape index: {}]   ;;  %s822_s5 = inlined_call_operand.vmem [shape: f32[128,8], index: 5, kind: input, shape index: {}]   ;;  %s823_s6 = inlined_call_operand.vmem [shape: f32[1,8], index: 6, kind: input, shape index: {}]   ;;  %s824_s7 = inlined_call_operand.vmem [shape: f32[32,8], index: 7, kind: output, shape index: {}]  }
   0x1 LB: > { %s218_s27 = sshll.u32 %s820_s3, 4  ;;  %s578_s28 = sadd.s32 4294967295, %s678_s24   ;;  %s678_s24 = sphi %s724_s24, %s18_s24   ;;  %s219_s27 = int_to_ptr.hbm [resolvable:$true] %s218_s27 }
   0x2   : > { %p580_p0 = scmp.ge.s32.totalorder %s678_s24, 1  ;;  %p201_p1 = scmp.lt.s32.totalorder %s678_s24, 3 }
   0x3   : > { %p601_p2 = scmp.eq.s32.totalorder %s578_s28, 0  ;;  %s680_s29 = smov [#allocation2]  }
   0x4   : > { %p202_p3 = pnand %p580_p0, %p201_p1  ;;  %s220_s30 = sshll.u32 %s680_s29, 4  ;;  %s221_s30 = int_to_ptr.vmem [resolvable:$true] %s220_s30 }
   0x5   : > { %s681_s8 = smov 128   ;;  %s682_s9 = smov 8  }
   0x6   : > { %p597_p4 = pneg %p202_p3  ;;  %254 = sbr.rel (%p202_p3) target bundleno = 699 (0x2bb), region = 48 }
   0x8   : > { %p598_p5 = pnand %p601_p2, %p597_p4 }
   0xa   : > { %600 = dma.hbm_to_vmem [thread:$0]  (!%p598_p5), %s219_s27, 6144, %s221_s30, [#allocation3], %s681_s8, %s681_s8, %s682_s9  }
   0xb   : > { %673 = dma.done.wait (%p601_p2), [#allocation3], 6144  }
   0xc   : > { %675 = vsyncadd (%p601_p2), [#allocation3], 4294961152  ;;  %s585_s10 = sshll.u32 %s578_s28, 1  ;;  %v683_v0 = vmov 0   ;;  %v340_v2 = vld [vmem:[#allocation2 + $0x78] sm:$0xff]  ;;  %v339_v3 = vld [vmem:[#allocation2 + $0x70] sm:$0xff] }
   0xd   : > { %615 = vset.pattern.permute.xlu0 %v683_v0  ;;  %p288_p6 = scmp.lt.s32.totalorder %s585_s10, 3  ;;  %345 = vmatpush.msra.mxu0 %v340_v2  ;;  %v338_v4 = vld [vmem:[#allocation2 + $0x68] sm:$0xff]  ;;  %v337_v5 = vld [vmem:[#allocation2 + $0x60] sm:$0xff]  ;;  %v336_v7 = vld [vmem:[#allocation2 + $0x58] sm:$0xff]  ;;  %vm507_vm0 = vcmask 64512  }
   0xe   : > { %v335_v8 = vld [vmem:[#allocation2 + $0x50] sm:$0xff]  ;;  %v334_v9 = vld [vmem:[#allocation2 + $0x48] sm:$0xff]  ;;  %v333_v10 = vld [vmem:[#allocation2 + $0x40] sm:$0xff] }
   0xf   : > { %s826_s10 = smov (!%p288_p6, %s585_s10), 3  ;;  %346 = vmatpush.msra.mxu0 %v339_v3  ;;  %v332_v11 = vld [vmem:[#allocation2 + $0x38] sm:$0xff]  ;;  %v331_v12 = vld [vmem:[#allocation2 + $0x30] sm:$0xff]  ;;  %v330_v13 = vld [vmem:[#allocation2 + $0x28] sm:$0xff] }
  0x10   : > { %s586_s11 = sshll.u32 %s826_s10, 3  ;;  %v329_v14 = vld [vmem:[#allocation2 + $0x20] sm:$0xff]  ;;  %v328_v15 = vld [vmem:[#allocation2 + $0x18] sm:$0xff]  ;;  %v327_v16 = vld [vmem:[#allocation2 + $0x10] sm:$0xff] }
  0x11   : > { %s291_s14 = scalar_lea.vmem %s817_s0, %s586_s11  ;;  %347 = vmatpush.msra.mxu0 %v338_v4  ;;  %v326_v17 = vld [vmem:[#allocation2 + $0x8] sm:$0xff]  ;;  %v325_v18 = vld [vmem:[#allocation2] sm:$0xff]  ;;  %v386_v19 = vld [vmem:[#allocation2 + $0xf8] sm:$0xff]  ;;  %s297_s21 = scalar_lea.vmem %s824_s7, %s586_s11 }
  0x12   : > { %v299_v1 = vld [vmem:[%s291_s14] sm:$0xff]  ;;  %v300_v6 = vld [vmem:[%s291_s14 + $0x8] sm:$0xff]  ;;  %v385_v20 = vld [vmem:[#allocation2 + $0xf0] sm:$0xff]  ;;  %392 = vmatpush.msra.mxu1 %v386_v19 }
  0x13   : > { %304 = vperm.xlu0 %615, %v299_v1   ;;  %348 = vmatpush.msra.mxu0 %v337_v5  ;;  %v384_v21 = vld [vmem:[#allocation2 + $0xe8] sm:$0xff]  ;;  %v383_v22 = vld [vmem:[#allocation2 + $0xe0] sm:$0xff]  ;;  %v382_v23 = vld [vmem:[#allocation2 + $0xd8] sm:$0xff] }
  0x14   : > { %393 = vmatpush.msra.mxu1 %v385_v20  ;;  %v381_v24 = vld [vmem:[#allocation2 + $0xd0] sm:$0xff]  ;;  %v616_v25 = vld [vmem:[%s818_s1] ss:$0 sm:$0xff]  ;;  %v380_v26 = vld [vmem:[#allocation2 + $0xc8] sm:$0xff] }
  0x15   : > { %349 = vmatpush.msra.mxu0 %v336_v7  ;;  %v617_v27 = vld [vmem:[%s819_s2] ss:$0 sm:$0xff]  ;;  %v378_v31 = vld [vmem:[#allocation2 + $0xb8] sm:$0xff]  ;;  %v377_v33 = vld [vmem:[#allocation2 + $0xb0] sm:$0xff] }
  0x16   : > { %394 = vmatpush.msra.mxu1 %v384_v21  ;;  %v379_v29 = vld [vmem:[#allocation2 + $0xc0] sm:$0xff]  ;;  %v376_v34 = vld [vmem:[#allocation2 + $0xa8] sm:$0xff]  ;;  %v374_v41 = vld [vmem:[#allocation2 + $0x98] sm:$0xff] }
  0x17   : > { %350 = vmatpush.msra.mxu0 %v335_v8  ;;  %v375_v40 = vld [vmem:[#allocation2 + $0xa0] sm:$0xff]  ;;  %v373_v42 = vld [vmem:[#allocation2 + $0x90] sm:$0xff]  ;;  %v372_v43 = vld [vmem:[#allocation2 + $0x88] sm:$0xff] }
  0x18   : > { %395 = vmatpush.msra.mxu1 %v383_v22  ;;  %v371_v44 = vld [vmem:[#allocation2 + $0x80] sm:$0xff]  ;;  %v433_v45 = vld [vmem:[#allocation2 + $0x178] sm:$0xff]  ;;  %v432_v46 = vld [vmem:[#allocation2 + $0x170] sm:$0xff] }
  0x19   : > { %351 = vmatpush.msra.mxu0 %v334_v9  ;;  %439 = vmatpush.msra.mxu2 %v433_v45  ;;  %v431_v47 = vld [vmem:[#allocation2 + $0x168] sm:$0xff]  ;;  %v430_v48 = vld [vmem:[#allocation2 + $0x160] sm:$0xff]  ;;  %v429_v49 = vld [vmem:[#allocation2 + $0x158] sm:$0xff] }
  0x1a   : > { %396 = vmatpush.msra.mxu1 %v382_v23  ;;  %v428_v50 = vld [vmem:[#allocation2 + $0x150] sm:$0xff]  ;;  %v427_v51 = vld [vmem:[#allocation2 + $0x148] sm:$0xff]  ;;  %v618_v52 = vld [vmem:[%s821_s4] ss:$0 sm:$0xff] }
  0x1b   : > { %309 = vperm.xlu0 %615, %v300_v6   ;;  %352 = vmatpush.msra.mxu0 %v333_v10  ;;  %v426_v53 = vld [vmem:[#allocation2 + $0x140] sm:$0xff]  ;;  %v425_v55 = vld [vmem:[#allocation2 + $0x138] sm:$0xff]  ;;  %v424_v57 = vld [vmem:[#allocation2 + $0x130] sm:$0xff] }
  0x1c   : > { %397 = vmatpush.msra.mxu1 %v381_v24  ;;  %440 = vmatpush.msra.mxu2 %v432_v46  ;;  %v423_v58 = vld [vmem:[#allocation2 + $0x128] sm:$0xff]  ;;  %v422_v63 = vld [vmem:[#allocation2 + $0x120] sm:$0xff]  ;;  %v421_v0 = vld [vmem:[#allocation2 + $0x118] sm:$0xff] }
  0x1d   : > { %353 = vmatpush.msra.mxu0 %v332_v11  ;;  %v420_v1 = vld [vmem:[#allocation2 + $0x110] sm:$0xff]  ;;  %v419_v2 = vld [vmem:[#allocation2 + $0x108] sm:$0xff]  ;;  %v418_v3 = vld [vmem:[#allocation2 + $0x100] sm:$0xff] }
  0x1e   : > { %398 = vmatpush.msra.mxu1 %v380_v26  ;;  %441 = vmatpush.msra.mxu2 %v431_v47  ;;  %v479_v4 = vld [vmem:[%s822_s5 + $0x78] sm:$0xff]  ;;  %v478_v5 = vld [vmem:[%s822_s5 + $0x70] sm:$0xff]  ;;  %v477_v6 = vld [vmem:[%s822_s5 + $0x68] sm:$0xff] }
  0x1f   : > { %354 = vmatpush.msra.mxu0 %v331_v12  ;;  %484 = vmatpush.msra.mxu3 %v479_v4  ;;  %v476_v7 = vld [vmem:[%s822_s5 + $0x60] sm:$0xff]  ;;  %v475_v8 = vld [vmem:[%s822_s5 + $0x58] sm:$0xff]  ;;  %v474_v9 = vld [vmem:[%s822_s5 + $0x50] sm:$0xff] }
  0x20   : > { %399 = vmatpush.msra.mxu1 %v379_v29  ;;  %442 = vmatpush.msra.mxu2 %v430_v48  ;;  %v473_v10 = vld [vmem:[%s822_s5 + $0x48] sm:$0xff]  ;;  %v619_v11 = vld [vmem:[%s821_s4 + $0x1] ss:$0 sm:$0xff]  ;;  %v467_v23 = vld [vmem:[%s822_s5 + $0x18] sm:$0xff] }
  0x21   : > { %355 = vmatpush.msra.mxu0 %v330_v13  ;;  %485 = vmatpush.msra.mxu3 %v478_v5  ;;  %v472_v12 = vld [vmem:[%s822_s5 + $0x40] sm:$0xff]  ;;  %v466_v24 = vld [vmem:[%s822_s5 + $0x10] sm:$0xff] }
  0x22   : > { %400 = vmatpush.msra.mxu1 %v378_v31  ;;  %443 = vmatpush.msra.mxu2 %v429_v49  ;;  %v468_v22 = vld [vmem:[%s822_s5 + $0x20] sm:$0xff] }
  0x23   : > { %356 = vmatpush.msra.mxu0 %v329_v14  ;;  %486 = vmatpush.msra.mxu3 %v477_v6  ;;  %v471_v14 = vld [vmem:[%s822_s5 + $0x38] sm:$0xff]  ;;  %v464_v26 = vld [vmem:[%s822_s5] sm:$0xff] }
  0x24   : > { %401 = vmatpush.msra.mxu1 %v377_v33  ;;  %444 = vmatpush.msra.mxu2 %v428_v50 }
  0x25   : > { %357 = vmatpush.msra.mxu0 %v328_v15  ;;  %487 = vmatpush.msra.mxu3 %v476_v7 }
  0x26   : > { %402 = vmatpush.msra.mxu1 %v376_v34  ;;  %445 = vmatpush.msra.mxu2 %v427_v51  ;;  %v621_v34 = vld [vmem:[%s823_s6] ss:$0 sm:$0xff] }
  0x27   : > { %358 = vmatpush.msra.mxu0 %v327_v16  ;;  %488 = vmatpush.msra.mxu3 %v475_v8  ;;  %v470_v16 = vld [vmem:[%s822_s5 + $0x30] sm:$0xff] }
  0x28   : > { %403 = vmatpush.msra.mxu1 %v375_v40  ;;  %446 = vmatpush.msra.mxu2 %v426_v53 }
  0x29   : > { %359 = vmatpush.msra.mxu0 %v326_v17  ;;  %489 = vmatpush.msra.mxu3 %v474_v9  ;;  %v469_v17 = vld [vmem:[%s822_s5 + $0x28] sm:$0xff] }
  0x2a   : > { %404 = vmatpush.msra.mxu1 %v374_v41  ;;  %447 = vmatpush.msra.mxu2 %v425_v55 }
  0x2b   : > { %360 = vmatpush.msra.mxu0 %v325_v18  ;;  %490 = vmatpush.msra.mxu3 %v473_v10 }
  0x2c   : > { %405 = vmatpush.msra.mxu1 %v373_v42  ;;  %448 = vmatpush.msra.mxu2 %v424_v57 }
  0x2d   : > { %491 = vmatpush.msra.mxu3 %v472_v12 }
  0x2e   : > { %406 = vmatpush.msra.mxu1 %v372_v43  ;;  %449 = vmatpush.msra.mxu2 %v423_v58 }
  0x2f   : > { %492 = vmatpush.msra.mxu3 %v471_v14 }
  0x30   : > { %407 = vmatpush.msra.mxu1 %v371_v44  ;;  %450 = vmatpush.msra.mxu2 %v422_v63 }
  0x31   : > { %493 = vmatpush.msra.mxu3 %v470_v16 }
  0x32   : > { %451 = vmatpush.msra.mxu2 %v421_v0 }
  0x33   : > { %494 = vmatpush.msra.mxu3 %v469_v17 }
  0x34   : > { %452 = vmatpush.msra.mxu2 %v420_v1 }
  0x35   : > { %495 = vmatpush.msra.mxu3 %v468_v22 }
  0x36   : > { %453 = vmatpush.msra.mxu2 %v419_v2 }
  0x37   : > { %496 = vmatpush.msra.mxu3 %v467_v23 }
  0x38   : > { %454 = vmatpush.msra.mxu2 %v418_v3 }
  0x39   : > { %497 = vmatpush.msra.mxu3 %v466_v24 }
  0x85   : > { %v305_v28 = vpop.permute.xlu0 %304 }
  0x86   : > { %v315_v30 = vmul.f32 %v616_v25, %v305_v28 }
  0x88   : > { %v321_v32 = vadd.f32 %v617_v27, %v315_v30 }
  0x8a   : > { %622 = vtanh.f32 %v321_v32 }
  0x8d   : > { %v310_v35 = vpop.permute.xlu0 %309 }
  0x8e   : > { %v316_v36 = vmul.f32 %v616_v25, %v310_v35  ;;  %v465_v25 = vld [vmem:[%s822_s5 + $0x8] sm:$0xff] }
  0x8f   : > { %498 = vmatpush.msra.mxu3 %v465_v25 }
  0x90   : > { %v623_v37 = vpop.eup %622  ;;  %v322_v38 = vadd.f32 %v617_v27, %v316_v36  ;;  %v620_v27 = vld [vmem:[%s821_s4 + $0x2] ss:$0 sm:$0xff] }
  0x91   : > { %361 = vmatmul.f32.vlgmr.msra.gmra.mxu0 %v623_v37  ;;  %499 = vmatpush.msra.mxu3 %v464_v26 }
  0x92   : > { %624 = vtanh.f32 %v322_v38 }
  0x98   : > { %v625_v39 = vpop.eup %624 }
  0x99   : > { %364 = vmatmul.f32.gmra.mxu0 %v625_v39 }
 0x10e   : > { %v362_v54 = vpop.f32.mrf.mxu0 }
 0x10f   : > { %v363_v56 = vadd.f32 %v618_v52, %v362_v54 }
 0x111   : > { %626 = vtanh.f32 %v363_v56 }
 0x116   : > { %v365_v59 = vpop.f32.mrf.mxu0 }
 0x117   : > { %v627_v60 = vpop.eup %626  ;;  %v366_v61 = vadd.f32 %v618_v52, %v365_v59 }
 0x118   : > { %408 = vmatmul.f32.vlgmr.msra.gmra.mxu1 %v627_v60 }
 0x119   : > { %628 = vtanh.f32 %v366_v61 }
 0x11f   : > { %v629_v62 = vpop.eup %628 }
 0x120   : > { %411 = vmatmul.f32.gmra.mxu1 %v629_v62 }
 0x195   : > { %v409_v13 = vpop.f32.mrf.mxu1 }
 0x196   : > { %v410_v15 = vadd.f32 %v619_v11, %v409_v13 }
 0x198   : > { %630 = vtanh.f32 %v410_v15 }
 0x19d   : > { %v412_v18 = vpop.f32.mrf.mxu1 }
 0x19e   : > { %v631_v19 = vpop.eup %630  ;;  %v413_v20 = vadd.f32 %v619_v11, %v412_v18 }
 0x19f   : > { %455 = vmatmul.f32.vlgmr.msra.gmra.mxu2 %v631_v19 }
 0x1a0   : > { %632 = vtanh.f32 %v413_v20 }
 0x1a6   : > { %v633_v21 = vpop.eup %632 }
 0x1a7   : > { %458 = vmatmul.f32.gmra.mxu2 %v633_v21 }
 0x222   : > { %v456_v28 = vpop.f32.mrf.mxu2 }
 0x223   : > { %v457_v29 = vadd.f32 %v620_v27, %v456_v28 }
 0x225   : > { %634 = vtanh.f32 %v457_v29 }
 0x22a   : > { %v459_v30 = vpop.f32.mrf.mxu2 }
 0x22b   : > { %v635_v31 = vpop.eup %634  ;;  %v460_v32 = vadd.f32 %v620_v27, %v459_v30 }
 0x22c   : > { %500 = vmatmul.f32.vlgmr.msra.gmra.mxu3 %v635_v31 }
 0x22d   : > { %636 = vtanh.f32 %v460_v32 }
 0x233   : > { %v637_v33 = vpop.eup %636 }
 0x234   : > { %503 = vmatmul.f32.gmra.mxu3 %v637_v33 }
 0x2af   : > { %v501_v35 = vpop.f32.mrf.mxu3 }
 0x2b0   : > { %v502_v36 = vadd.f32 %v621_v34, %v501_v35 }
 0x2b2   : > { %508 = vst.msk [vmem:[%s297_s21] sm:$0xff] %vm507_vm0, %v502_v36 }
 0x2b7   : > { %v504_v37 = vpop.f32.mrf.mxu3 }
 0x2b8   : > { %v505_v38 = vadd.f32 %v621_v34, %v504_v37 }
 0x2ba   : > { %509 = vst.msk [vmem:[%s297_s21 + $0x8] sm:$0xff] %vm507_vm0, %v505_v38 }
 0x2bb PF: > { %s18_s24 = sadd.s32 1, %s678_s24  }
 0x2bc   : > { %p15_p7 = scmp.ge.s32.totalorder %s18_s24, 4  }
 0x2be   :  { %17 = sbr.rel (!%p15_p7) target bundleno = 1 (0x1), region = 87 }
 0x2c3   :  { %532 = vsyncpa [#allocation3], 1 }
 0x2c4   :  { %534 = vsyncpa [#allocation3 + $0x1], 1 }

</bundles_post_ra>
